<compile_context>
chip_gen: v6e
topology: v6e:2x2x1
jax: 0.10.0
libtpu: 0.0.40
codegen_flags: <defaults>
</compile_context>

<pallas_src>
from typing import NamedTuple

import jax
import jax.numpy as jnp
from jax.experimental import pallas as pl
from jax.experimental.pallas import tpu as pltpu


def _round_up(x, m):
    return ((x + m - 1) // m) * m


# ---------------------------------------------------------------------------
# Kernels
# ---------------------------------------------------------------------------

def _hidden_kernel(x_ref, w1_ref, b1_ref, h_ref):
    # x: (TM, K) bf16   w1: (K, H) bf16   b1: (1, H) f32   h: (TM, H) bf16
    h = jnp.dot(x_ref[...], w1_ref[...],
                preferred_element_type=jnp.float32) + b1_ref[...]
    h_ref[...] = h.astype(h_ref.dtype)


def _logits_kernel(h_ref, w2_ref, b2_ref, o_ref):
    # h: (TM, H) bf16   w2: (H, TN) bf16   b2: (1, TN) f32   o: (TM, TN)
    out = jnp.dot(h_ref[...], w2_ref[...],
                  preferred_element_type=jnp.float32) + b2_ref[...]
    o_ref[...] = out.astype(o_ref.dtype)


# ---------------------------------------------------------------------------
# One-time parameter preparation (cast + pad happen ONCE, not per call)
# ---------------------------------------------------------------------------

class NGramParams(NamedTuple):
    emb_bf16: jax.Array   # (vocab, E)  bf16
    w1_bf16: jax.Array    # (K, H)      bf16
    b1_f32: jax.Array     # (1, H)      f32
    w2_bf16: jax.Array    # (H, Vp)     bf16 (vocab zero-padded to tile mult.)
    b2_f32: jax.Array     # (1, Vp)     f32  (vocab zero-padded)
    vocab_size: int       # real (unpadded) vocab
    tn: int               # vocab tile the padding was done for


def prepare_ngram_params(emb_table, w1, b1, w2, b2, *, tn=2048):
    """Cast weights to bf16 and pad the vocab dim once; call this at init."""
    H, V = w2.shape
    tn = _round_up(tn, 128)
    tn = min(tn, _round_up(V, 128))        # lane-dense, never larger than Vp
    Vp = _round_up(V, tn)

    w2b = w2.astype(jnp.bfloat16)
    b2r = b2.reshape(1, V).astype(jnp.float32)
    if Vp != V:
        # Zero-padding both w2 AND b2 keeps the padded logit columns at 0.
        w2b = jnp.pad(w2b, ((0, 0), (0, Vp - V)))
        b2r = jnp.pad(b2r, ((0, 0), (0, Vp - V)))

    return NGramParams(
        emb_bf16=emb_table.astype(jnp.bfloat16),
        w1_bf16=w1.astype(jnp.bfloat16),
        b1_f32=b1.reshape(1, H).astype(jnp.float32),
        w2_bf16=w2b,
        b2_f32=b2r,
        vocab_size=V,
        tn=tn,
    )


# ---------------------------------------------------------------------------
# Forward
# ---------------------------------------------------------------------------

def ngram_lm_forward(params: NGramParams, vec, *, tm=512,
                     out_dtype=jnp.float32):
    """vec: (B, context_size) int32 token ids. Returns (B, vocab) logits."""
    B = vec.shape[0]
    K, H = params.w1_bf16.shape            # K = context_size * embedding_dim
    Vp = params.w2_bf16.shape[1]
    V = params.vocab_size
    tn = params.tn

    # Embedding lookup + flatten = data-dependent gather, done in XLA glue.
    # Table is already bf16, so no per-call cast of x is needed.
    # TODO(synk): fuse the gather into the hidden kernel via
    #             PrefetchScalarGridSpec (token ids in SMEM + in-kernel take).
    x = params.emb_bf16[vec].reshape(B, K)

    # Batch tiling: sublane-aligned; only the tiny x array is ever padded.
    tm = min(tm, _round_up(B, 8))
    Bp = _round_up(B, tm)
    if Bp != B:
        x = jnp.pad(x, ((0, Bp - B), (0, 0)))

    # ---- GEMM1: h = x @ w1 + b1, once per batch tile (hoisted out of the
    #      vocab loop). Output is bf16 so it feeds the MXU directly in GEMM2.
    h = pl.pallas_call(
        _hidden_kernel,
        out_shape=jax.ShapeDtypeStruct((Bp, H), jnp.bfloat16),
        grid_spec=pltpu.PrefetchScalarGridSpec(
            num_scalar_prefetch=0,
            grid=(Bp // tm,),
            in_specs=[
                pl.BlockSpec((tm, K), lambda i: (i, 0)),   # x: streamed over B
                pl.BlockSpec((K, H), lambda i: (0, 0)),    # w1: resident
                pl.BlockSpec((1, H), lambda i: (0, 0)),    # b1: resident
            ],
            out_specs=pl.BlockSpec((tm, H), lambda i: (i, 0)),
        ),
        compiler_params=pltpu.CompilerParams(
            dimension_semantics=("parallel",)),
    )(x, params.w1_bf16, params.b1_f32)

    # ---- GEMM2: logits = h @ w2 + b2.
    # Grid order: vocab OUTER, batch INNER -> w2's block index is constant
    # along the inner axis, so each w2 tile is read from HBM exactly once per
    # call; only the tiny h tile (tm x 256 bf16) is re-streamed.
    grid = (Vp // tn, Bp // tm)

    # Explicit VMEM budget (double-buffered tiles + headroom); matters on v7x
    # where physical VMEM is 64 MiB and the scoped default is 32 MiB.
    out_bytes = jnp.dtype(out_dtype).itemsize
    vmem_budget = (2 * tm * tn * out_bytes      # output tiles
                   + 2 * H * tn * 2             # w2 tiles (bf16)
                   + 2 * tm * H * 2             # h tiles (bf16)
                   + 2 * tn * 4                 # b2 tiles
                   + (4 << 20))                 # compiler-internal headroom
    vmem_budget = max(int(vmem_budget), 16 << 20)

    out = pl.pallas_call(
        _logits_kernel,
        out_shape=jax.ShapeDtypeStruct((Bp, Vp), out_dtype),
        grid_spec=pltpu.PrefetchScalarGridSpec(
            num_scalar_prefetch=0,
            grid=grid,
            in_specs=[
                pl.BlockSpec((tm, H), lambda j, i: (i, 0)),   # h: inner-streamed
                pl.BlockSpec((H, tn), lambda j, i: (0, j)),   # w2: once per vocab tile
                pl.BlockSpec((1, tn), lambda j, i: (0, j)),   # b2: once per vocab tile
            ],
            out_specs=pl.BlockSpec((tm, tn), lambda j, i: (i, j)),
        ),
        compiler_params=pltpu.CompilerParams(
            # Both axes are stateless per-tile -> the (outer) vocab axis can
            # shard across v7x's two TensorCores even with a single batch tile.
            dimension_semantics=("parallel", "parallel"),
            vmem_limit_bytes=vmem_budget),
    )(h, params.w2_bf16, params.b2_f32)

    if Bp != B or Vp != V:
        out = out[:B, :V]
    return out


# ---------------------------------------------------------------------------
# Demo / self-test
# ---------------------------------------------------------------------------

if __name__ == "__main__":
    # Small, module-consistent shapes.
    vocab_size = 128
    embedding_dim = 32
    context_size = 4
    batch = 8
    hidden = 256

    key = jax.random.PRNGKey(0)
    k_emb, k_w1, k_b1, k_w2, k_b2, k_vec = jax.random.split(key, 6)

    # Deterministic synthetic parameters (shapes match nn.Module __init__,
    # weights stored as (in_features, out_features)).
    emb_table = jax.random.normal(k_emb, (vocab_size, embedding_dim), jnp.float32)
    w1 = jax.random.normal(k_w1, (embedding_dim * context_size, hidden), jnp.float32) * 0.05
    b1 = jax.random.normal(k_b1, (hidden,), jnp.float32) * 0.05
    w2 = jax.random.normal(k_w2, (hidden, vocab_size), jnp.float32) * 0.05
    b2 = jax.random.normal(k_b2, (vocab_size,), jnp.float32) * 0.05

    vec = jax.random.randint(k_vec, (batch, context_size), 0, vocab_size, jnp.int32)

    # One-time prep (bf16 cast + vocab pad happen here, NOT per forward call).
    params = prepare_ngram_params(emb_table, w1, b1, w2, b2, tn=2048)

    out = ngram_lm_forward(params, vec)
    out = jax.block_until_ready(out)
    assert out.shape == (batch, vocab_size)
    assert out.dtype == jnp.float32

    # Reference #1: same bf16-operand path as the kernels (tight tolerance).
    x_bf = emb_table.astype(jnp.bfloat16)[vec].reshape(batch, -1)
    h_bf = (jnp.dot(x_bf, w1.astype(jnp.bfloat16),
                    preferred_element_type=jnp.float32) + b1).astype(jnp.bfloat16)
    ref_bf = jnp.dot(h_bf, w2.astype(jnp.bfloat16),
                     preferred_element_type=jnp.float32) + b2
    assert jnp.allclose(out, ref_bf, atol=1e-2, rtol=1e-2)

    # Reference #2: pure f32 math (loose tolerance, sanity vs the torch module).
    # NOTE: operands are bf16-quantized in the kernel path, so exact f32 parity
    # is not expected (~1e-2 scale differences).
    x_f32 = emb_table[vec].reshape(batch, -1)
    ref_f32 = (x_f32 @ w1 + b1) @ w2 + b2
    assert jnp.allclose(out, ref_f32, atol=5e-2, rtol=5e-2)

    print("KERNEL_OK")
</pallas_src>

<mosaic_0001>
module attributes {stable_mosaic.version = 11 : i64} {
  func.func @_hidden_kernel(%arg0: i32, %arg1: memref<8x128xbf16, #tpu.memory_space<vmem>>, %arg2: memref<128x256xbf16, #tpu.memory_space<vmem>>, %arg3: memref<1x256xf32, #tpu.memory_space<vmem>>, %arg4: memref<8x256xbf16, #tpu.memory_space<vmem>>) attributes {dimension_semantics = [#tpu.dimension_semantics<parallel>], iteration_bounds = array<i64: 1>, scalar_prefetch = 0 : i64, scratch_operands = 0 : i64, tpu.core_type = #tpu.core_type<tc>, window_params = [{transform_indices = @transform_0, window_bounds = array<i64: 8, 128>}, {pipeline_mode = #tpu.pipeline_mode<synchronous>, transform_indices = @transform_1, window_bounds = array<i64: 128, 256>}, {pipeline_mode = #tpu.pipeline_mode<synchronous>, transform_indices = @transform_2, window_bounds = array<i64: 1, 256>}, {transform_indices = @transform_3, window_bounds = array<i64: 8, 256>}]} {
    %c0 = arith.constant 0 : index
    %c0_0 = arith.constant 0 : index
    %0 = vector.load %arg1[%c0, %c0_0] : memref<8x128xbf16, #tpu.memory_space<vmem>>, vector<8x128xbf16>
    %c0_1 = arith.constant 0 : index
    %c0_2 = arith.constant 0 : index
    %1 = vector.load %arg2[%c0_1, %c0_2] : memref<128x256xbf16, #tpu.memory_space<vmem>>, vector<128x256xbf16>
    %cst = arith.constant dense<0.000000e+00> : vector<8x256xf32>
    %2 = tpu.matmul %0, %1, %cst {dimension_numbers = #tpu.dot_dimension_numbers<[1], [0], [0], [1], [0, 0, 1, 1], [], []>} : vector<8x128xbf16>, vector<128x256xbf16>, vector<8x256xf32> -> vector<8x256xf32>
    %c0_3 = arith.constant 0 : index
    %c0_4 = arith.constant 0 : index
    %3 = vector.load %arg3[%c0_3, %c0_4] : memref<1x256xf32, #tpu.memory_space<vmem>>, vector<1x256xf32>
    %4 = vector.broadcast %3 : vector<1x256xf32> to vector<8x256xf32>
    %5 = arith.addf %2, %4 : vector<8x256xf32>
    %6 = arith.truncf %5 : vector<8x256xf32> to vector<8x256xbf16>
    %c0_5 = arith.constant 0 : index
    %c0_6 = arith.constant 0 : index
    %7 = vector.load %arg4[%c0_5, %c0_6] : memref<8x256xbf16, #tpu.memory_space<vmem>>, vector<8x256xbf16>
    tpu.vector_store %arg4[%c0_5, %c0_6], %6 {strides = array<i32>} : memref<8x256xbf16, #tpu.memory_space<vmem>>, vector<8x256xbf16>,
    return
  }
  func.func @transform_0(%arg0: i32) -> (i32, i32) {
    %c0_i32 = arith.constant 0 : i32
    %c0_i32_0 = arith.constant 0 : i32
    return %arg0, %c0_i32 : i32, i32
  }
  func.func @transform_1(%arg0: i32) -> (i32, i32) {
    %c0_i32 = arith.constant 0 : i32
    %c0_i32_0 = arith.constant 0 : i32
    %c0_i32_1 = arith.constant 0 : i32
    return %c0_i32, %c0_i32_0 : i32, i32
  }
  func.func @transform_2(%arg0: i32) -> (i32, i32) {
    %c0_i32 = arith.constant 0 : i32
    %c0_i32_0 = arith.constant 0 : i32
    %c0_i32_1 = arith.constant 0 : i32
    return %c0_i32, %c0_i32_0 : i32, i32
  }
  func.func @transform_3(%arg0: i32) -> (i32, i32) {
    %c0_i32 = arith.constant 0 : i32
    %c0_i32_0 = arith.constant 0 : i32
    return %arg0, %c0_i32 : i32, i32
  }
}

</mosaic_0001>

<bundles_post_ra>
// kernel: tpu_custom_call.1
= control target key start
LH: loop header
LB: loop body
LE: loop exit
PB: predicated region body
PF: predicated region fallthrough
CT: control target
= control target key end

     0   :  { %8 = vsyncpa [#allocation3], 0  ;;  %s369_s0 = inlined_call_operand.hbm [shape: bf16[8,128], index: 0, kind: input, shape index: {}]   ;;  %s370_s1 = inlined_call_operand.hbm [shape: bf16[128,256], index: 1, kind: input, shape index: {}]   ;;  %s371_s2 = inlined_call_operand.vmem [shape: f32[1,256], index: 2, kind: input, shape index: {}]   ;;  %s372_s3 = inlined_call_operand.hbm [shape: bf16[8,256], index: 3, kind: output, shape index: {}]  }
   0x1   :  { %9 = vsyncpa [#allocation6], 0 }
   0x2   :  { %10 = vsyncpa [#allocation4], 0  ;;  %s331_s12 = smov [#allocation2]   ;;  %s332_s14 = smov [#allocation5]  }
   0x3   :  { %s17_s13 = sshll.u32 %s331_s12, 4  ;;  %s26_s15 = sshll.u32 %s332_s14, 4  ;;  %s18_s13 = int_to_ptr.vmem [resolvable:$true] %s17_s13  ;;  %s27_s15 = int_to_ptr.vmem [resolvable:$true] %s26_s15 }
   0x4   :  { %s273_s16 = scalar_lea.vmem %s18_s13, 64  ;;  %p278_p1 = scmp.lt.s32.totalorder %s18_s13, %s18_s13 }
   0x5   :  { %p274_p0 = scmp.ne.s32.totalorder %s18_s13, %s273_s16  ;;  %p279_p2 = scmp.lt.s32.totalorder %s273_s16, %s273_s16 }
   0x7   :  { %p280_p3 = por %p279_p2, %p278_p1 }
   0x9   :  { %p281_p4 = pnand %p280_p3, %p274_p0 }
   0xb   :  { %284 = shalt.err (!%p281_p4)
}
   0xc   :  { %20 = dma.hbm_to_vmem [thread:$0]  %s369_s0, 64, %s18_s13, [#allocation3]  }
   0xd   :  { %s293_s19 = scalar_lea.vmem %s27_s15, 2048  ;;  %p298_p6 = scmp.lt.s32.totalorder %s27_s15, %s27_s15 }
   0xe   :  { %p294_p5 = scmp.ne.s32.totalorder %s27_s15, %s293_s19  ;;  %p299_p7 = scmp.lt.s32.totalorder %s293_s19, %s293_s19 }
  0x10   :  { %p300_p8 = por %p299_p7, %p298_p6 }
  0x12   :  { %p301_p9 = pnand %p300_p8, %p294_p5 }
  0x14   :  { %304 = shalt.err (!%p301_p9)
}
  0x15   :  { %s333_s20 = smov 128   ;;  %s334_s21 = smov 8  }
  0x16   :  { %32 = dma.hbm_to_vmem [thread:$0]  %s370_s1, 2048, %s27_s15, [#allocation6], %s333_s20, %s333_s20, %s334_s21  }
  0x17   :  { %325 = dma.done.wait [#allocation3], 64  }
  0x18   :  { %326 = vsyncadd [#allocation3], 4294967232 }
  0x19   :  { %327 = dma.done.wait [#allocation6], 2048  }
  0x1a   :  { %328 = vsyncadd [#allocation6], 4294965248  ;;  %v335_v0 = vmov 0   ;;  %v241_v1 = vld [vmem:[#allocation5 + $0x74] ss:$8 sps:$4 sm:$0xff]   ;;  %v61_v18 = vlaneseq  ;;  %s336_s24 = smov [#allocation7]  }
  0x1b   :  { %183 = vmatprep.mubr.bf16.mxu0 %v335_v0  ;;  %v243_v2 = vld [vmem:[#allocation5 + $0x70] ss:$8 sps:$4 sm:$0xff]   ;;  %151 = vmatprep.subr.bf16.mxu0 %v241_v1  ;;  %v244_v3 = vld [vmem:[#allocation5 + $0x64] ss:$8 sps:$4 sm:$0xff]   ;;  %v246_v4 = vld [vmem:[#allocation5 + $0x60] ss:$8 sps:$4 sm:$0xff]  }
  0x1c   :  { %152 = vmatpush1.bf16.msra.mxu0 %v243_v2  ;;  %v247_v5 = vld [vmem:[#allocation5 + $0x54] ss:$8 sps:$4 sm:$0xff]   ;;  %v249_v6 = vld [vmem:[#allocation5 + $0x50] ss:$8 sps:$4 sm:$0xff]   ;;  %v250_v7 = vld [vmem:[#allocation5 + $0x44] ss:$8 sps:$4 sm:$0xff]  }
  0x1d   :  { %153 = vmatprep.subr.bf16.mxu0 %v244_v3  ;;  %v252_v8 = vld [vmem:[#allocation5 + $0x40] ss:$8 sps:$4 sm:$0xff]   ;;  %v253_v9 = vld [vmem:[#allocation5 + $0x34] ss:$8 sps:$4 sm:$0xff]   ;;  %v255_v10 = vld [vmem:[#allocation5 + $0x30] ss:$8 sps:$4 sm:$0xff]  }
  0x1e   :  { %v256_v11 = vld [vmem:[#allocation5 + $0x24] ss:$8 sps:$4 sm:$0xff]   ;;  %v258_v12 = vld [vmem:[#allocation5 + $0x20] ss:$8 sps:$4 sm:$0xff]   ;;  %v259_v13 = vld [vmem:[#allocation5 + $0x14] ss:$8 sps:$4 sm:$0xff]  }
  0x1f   :  { %v261_v14 = vld [vmem:[#allocation5 + $0x10] ss:$8 sps:$4 sm:$0xff]   ;;  %v262_v15 = vld [vmem:[#allocation5 + $0x4] ss:$8 sps:$4 sm:$0xff]   ;;  %v264_v16 = vld [vmem:[#allocation5] ss:$8 sps:$4 sm:$0xff]  }
  0x20   :  { %154 = vmatpush1.bf16.msra.mxu0 %v246_v4  ;;  %v42_v17 = vld [vmem:[#allocation2] sm:$0xf]  ;;  %v62_v19 = vshrl.u32 %v61_v18, 7  ;;  %s207_s25 = sshll.u32 %s336_s24, 4  ;;  %s208_s25 = int_to_ptr.vmem [resolvable:$true] %s207_s25 }
  0x21   :  { %155 = vmatprep.subr.bf16.mxu0 %v247_v5  ;;  %v59_v22 = vld [vmem:[%s371_s2] sm:$0x3]  ;;  %s305_s26 = scalar_lea.vmem %s208_s25, 128  ;;  %p310_p11 = scmp.lt.s32.totalorder %s208_s25, %s208_s25 }
  0x22   :  { %v63_v20 = vsub.s32 0, %v62_v19  ;;  %v67_v21 = vsub.s32 1, %v62_v19  ;;  %p306_p10 = scmp.ne.s32.totalorder %s208_s25, %s305_s26  ;;  %p311_p12 = scmp.lt.s32.totalorder %s305_s26, %s305_s26 }
  0x24   :  { %156 = vmatpush1.bf16.msra.mxu0 %v249_v6  ;;  %v64_v23 = vrot.slane %v59_v22, %v63_v20  ;;  %v68_v24 = vrot.slane %v59_v22, %v67_v21  ;;  %p312_p13 = por %p311_p12, %p310_p11 }
  0x25   :  { %157 = vmatprep.subr.bf16.mxu0 %v250_v7 }
  0x26   :  { %p313_p0 = pnand %p312_p13, %p306_p10 }
  0x28   :  { %158 = vmatpush1.bf16.msra.mxu0 %v252_v8 }
  0x29   :  { %159 = vmatprep.subr.bf16.mxu0 %v253_v9 }
  0x2c   :  { %160 = vmatpush1.bf16.msra.mxu0 %v255_v10 }
  0x2d   :  { %161 = vmatprep.subr.bf16.mxu0 %v256_v11 }
  0x30   :  { %162 = vmatpush1.bf16.msra.mxu0 %v258_v12 }
  0x31   :  { %163 = vmatprep.subr.bf16.mxu0 %v259_v13 }
  0x34   :  { %164 = vmatpush1.bf16.msra.mxu0 %v261_v14 }
  0x35   :  { %165 = vmatprep.subr.bf16.mxu0 %v262_v15 }
  0x38   :  { %166 = vmatpush1.bf16.msra.mxu0 %v264_v16 }
  0x3b   :  { %184 = vmatmul.mubr.bf16.vlgmr.msra.gmra.mxu0 %v42_v17 }
  0xfb   :  { %v185_v25 = vpop.f32.mrf.mxu0 }
  0xfc   :  { %v186_v27 = vadd.f32 %v185_v25, %v64_v23 }
  0xfd   :  { %v187_v26 = vpop.f32.mrf.mxu0 }
  0xfe   :  { %v188_v28 = vadd.f32 %v187_v26, %v68_v24 }
  0xff   :  { %v189_v29 = vpop.f32.mrf.mxu0 }
 0x100   :  { %v234_v30 = vpack.c.bf16 %v188_v28, %v186_v27 }
 0x101   :  { %v190_v31 = vpop.f32.mrf.mxu0 }
 0x102   :  { %200 = vst [vmem:[#allocation7] sm:$0xff] %v234_v30 }
 0x103   :  { %316 = shalt.err (!%p313_p0)
}
 0x104   :  { %210 = dma.vmem_to_hbm [thread:$0]  %s208_s25, 128, %s372_s3, [#allocation4]  }
 0x105   :  { %329 = dma.done.wait [#allocation4], 128  }
 0x106   :  { %330 = vsyncadd [#allocation4], 4294967168 }
 0x107   :  { %214 = vsyncpa [#allocation3], 1 }
 0x108   :  { %215 = vsyncpa [#allocation6], 1 }
 0x109   :  { %216 = vsyncpa [#allocation4], 1 }

</bundles_post_ra>
